<compile_context>
chip_gen: v7x
topology: tpu7x:2x2x1
jax: 0.10.0
libtpu: 0.0.40
codegen_flags: <defaults>
</compile_context>

<pallas_src>
import functools

import jax
import jax.numpy as jnp
import numpy as np
from jax import lax
from jax.experimental import pallas as pl
from jax.experimental.pallas import tpu as pltpu

EPS = 1e-6
_TK_TARGET = 512   # preferred feature-tile width (lanes) for the pipelined grid


def _dcl_kernel(ctgt_ref, tgt_ref, x1_ref, x2_ref, out_ref,
                cross_acc, xpow_acc, cpow_acc, *, feat_norm, mxu_bf16):
    """One grid step over a feature tile of width tk.

    Accumulates centers @ x^T, per-column ||x||^2 and ||centers||^2 partials in
    VMEM scratch; the hard-negative-mining epilogue runs on the last step.
    """
    f32 = jnp.float32
    k = pl.program_id(0)
    nk = pl.num_programs(0)

    @pl.when(k == 0)
    def _init():
        cross_acc[...] = jnp.zeros_like(cross_acc)
        xpow_acc[...] = jnp.zeros_like(xpow_acc)
        cpow_acc[...] = jnp.zeros_like(cpow_acc)

    ctgt = ctgt_ref[...]                               # (id_num, 1) int32
    tgt = tgt_ref[...]                                 # (1, 2B)    int32
    is_pos = ctgt == tgt                               # (id_num, 2B) bool

    # Fused chunk-0 / chunk-2 operand: one (2B, tk) tile -> one center matmul and
    # one cross matmul per step instead of the duplicated per-chunk pairs.
    x = jnp.concatenate([x1_ref[...], x2_ref[...]], axis=0).astype(f32)
    if feat_norm:
        # Row L2 normalization needs the full feature row -> wrapper forces nk == 1.
        x = x * lax.rsqrt(jnp.sum(x * x, axis=-1, keepdims=True) + 1e-12)

    dims = (((1,), (1,)), ((), ()))                    # contract both minor dims (A @ B^T)

    # Per-column squared norms accumulated as a (1, 2B) row via a ones-row MXU push
    # (hides under the big matmuls' drain).  Skipped entirely under feat_norm.
    if feat_norm:
        xpow_acc[...] = jnp.ones_like(xpow_acc)        # ||x||^2 == 1 after L2 norm
    else:
        ones_row = jnp.ones((1, x.shape[1]), f32)
        xpow_acc[...] += lax.dot_general(ones_row, x * x, dims,
                                         preferred_element_type=f32)

    # MXU operand dtype (f32 accumulation either way); masks cast directly (exact 0/1).
    mm = jnp.bfloat16 if mxu_bf16 else f32
    x_mm = x.astype(mm)
    memb = is_pos.astype(mm)                           # (id_num, 2B)

    # Per-identity member count computed in-kernel (no sampler-layout assumption).
    cnt = jnp.sum(is_pos.astype(f32), axis=1, keepdims=True)       # (id_num, 1)
    inv_members = 1.0 / jnp.maximum(cnt, 1.0)

    centers = jnp.dot(memb, x_mm, preferred_element_type=f32) * inv_members  # (id, tk)
    cpow_acc[...] += jnp.sum(centers * centers, axis=1, keepdims=True)       # (id, 1)
    cross_acc[...] += lax.dot_general(centers.astype(mm), x_mm, dims,
                                      preferred_element_type=f32)            # (id, 2B)

    @pl.when(k == nk - 1)
    def _epilogue():
        # pdist_torch: ||c||^2 + ||x||^2 - 2 c.x, clamp to 1e-12, sqrt.
        dist = jnp.sqrt(jnp.maximum(
            cpow_acc[...] + xpow_acc[...] - 2.0 * cross_acc[...], 1e-12))
        valid = dist > EPS                             # mirrors the `> 1e-6` filters
        neg = jnp.logical_and(jnp.logical_not(is_pos), valid).astype(f32)
        pos = jnp.logical_and(is_pos, valid).astype(f32)

        neg_sum = jnp.sum(dist * neg, axis=1, keepdims=True)       # (id_num, 1)
        neg_cnt = jnp.sum(neg, axis=1, keepdims=True)
        # Exact divide: d_neg feeds the discrete `dist < d_neg` mining decision.
        d_neg = neg_sum / jnp.maximum(neg_cnt, 1.0)

        hard = neg * (dist < d_neg).astype(f32)
        hard_sum = jnp.sum(dist * hard, axis=1, keepdims=True)
        hard_cnt = jnp.sum(hard, axis=1, keepdims=True)
        # Per-row mean via EUP approx reciprocal (intentional ~1e-3 rel error);
        # an empty hard set yields 0 (reference would produce NaN there).
        row_an = hard_sum * pl.reciprocal(jnp.maximum(hard_cnt, 1.0), approx=True)
        an_mean = jnp.sum(row_an) * (1.0 / row_an.shape[0])

        ap_sum = jnp.sum(dist * pos)
        ap_cnt = jnp.sum(pos)
        ap_mean = ap_sum / jnp.maximum(ap_cnt, 1.0)

        out_ref[0, 0] = ap_mean / an_mean


def _vmem_budget_bytes():
    """Generation-aware VMEM budget: 75% of physical per-TC VMEM (48 MiB fallback)."""
    cap = 64 * 1024 * 1024
    try:
        cap = int(getattr(pltpu.get_tpu_info(), "vmem_capacity_bytes", cap))
    except Exception:
        pass
    return (cap * 3) // 4


def _vmem_estimate(B, tk, id_num, itemsize):
    """Generous per-step VMEM footprint estimate (uses the real input itemsize)."""
    x_tiles = 2 * 2 * B * tk * itemsize            # two input specs, double-buffered
    f32_work = 6 * 2 * B * tk * 4                  # concat + f32/bf16 casts + x*x
    acc = (id_num * 2 * B + 2 * B + id_num) * 4    # accumulators
    epilogue = 12 * id_num * 2 * B * 4             # dist / mask temporaries
    return x_tiles + f32_work + acc + epilogue + (4 << 20)


def _choose_tile_k(D, B, id_num, itemsize, feat_norm, budget):
    if feat_norm or D % 128 != 0 or D <= _TK_TARGET:
        return D                                   # single feature tile (full-dim block)
    cands = [t for t in range(_TK_TARGET, 0, -128) if D % t == 0]
    for t in cands:
        if _vmem_estimate(B, t, id_num, itemsize) <= budget:
            return t
    return cands[-1]                               # 128 always divides D here


def dcl_loss(inputs, targets, num_pos=4, feat_norm="no", mxu_bf16=True,
             interpret=False):
    """JAX/Pallas equivalent of DCL.forward(inputs, targets)."""
    total, D = inputs.shape
    B = total // 3                      # per-chunk rows (chunks 0 and 2 are kept)
    id_num = B // num_pos
    norm = (feat_norm == "yes")

    itemsize = jnp.dtype(inputs.dtype).itemsize
    budget = _vmem_budget_bytes()
    tk = _choose_tile_k(D, B, id_num, itemsize, norm, budget)
    nk = D // tk if (tk != D) else 1

    # Tiny int32 side inputs (sliced host-side).
    t = targets.astype(jnp.int32)
    tgt = jnp.concatenate([t[:B], t[2 * B: 3 * B]]).reshape(1, 2 * B)
    ctgt = t[: id_num * num_pos: num_pos].reshape(id_num, 1)

    vmem = pltpu.MemorySpace.VMEM
    in_specs = [
        pl.BlockSpec((id_num, 1), lambda k: (0, 0), memory_space=vmem),
        pl.BlockSpec((1, 2 * B), lambda k: (0, 0), memory_space=vmem),
    ]
    if B % 8 == 0:
        # Zero-copy: DMA chunk 0 and chunk 2 directly out of the full inputs buffer
        # (same array passed twice, different block row indices). No wrapper concat,
        # no HBM pass over the discarded middle chunk.
        in_specs += [
            pl.BlockSpec((B, tk), lambda k: (0, k)),   # rows [0, B)
            pl.BlockSpec((B, tk), lambda k: (2, k)),   # rows [2B, 3B)
        ]
        x_args = (inputs, inputs)
    else:
        # Sublane-unaligned chunk size: explicit slices (one extra 2*B*D copy).
        in_specs += [
            pl.BlockSpec((B, tk), lambda k: (0, k)),
            pl.BlockSpec((B, tk), lambda k: (0, k)),
        ]
        x_args = (inputs[:B], inputs[2 * B: 3 * B])

    cost = pl.CostEstimate(
        flops=int(8 * id_num * B * D + 6 * B * D + 64 * id_num * B),
        transcendentals=int(2 * id_num * B + id_num + (2 * B if norm else 0)),
        bytes_accessed=int(2 * B * D * itemsize + (2 * B + id_num) * 4 + 4),
    )
    vmem_limit = int(min(budget, max(16 * 1024 * 1024,
                                     2 * _vmem_estimate(B, tk, id_num, itemsize))))

    kernel = functools.partial(_dcl_kernel, feat_norm=norm, mxu_bf16=mxu_bf16)

    out = pl.pallas_call(
        kernel,
        out_shape=jax.ShapeDtypeStruct((1, 1), jnp.float32),
        grid=(nk,),
        in_specs=in_specs,
        out_specs=pl.BlockSpec((1, 1), lambda k: (0, 0),
                               memory_space=pltpu.MemorySpace.SMEM),
        scratch_shapes=[
            pltpu.VMEM((id_num, 2 * B), jnp.float32),   # centers @ x^T accumulator
            pltpu.VMEM((1, 2 * B), jnp.float32),        # ||x||^2 accumulator
            pltpu.VMEM((id_num, 1), jnp.float32),       # ||centers||^2 accumulator
        ],
        compiler_params=pltpu.CompilerParams(
            dimension_semantics=("arbitrary",),
            vmem_limit_bytes=vmem_limit),
        cost_estimate=cost,
        interpret=interpret,
    )(ctgt, tgt, *x_args)
    return out[0, 0]


def dcl_reference(inputs, targets, num_pos=4):
    """NumPy reference mirroring the PyTorch code (with data-dependent indexing)."""
    inputs = np.asarray(inputs, np.float64)
    targets = np.asarray(targets)
    B = inputs.shape[0] // 3
    x = np.concatenate([inputs[:B], inputs[2 * B:]], 0)
    t = np.concatenate([targets[:B], targets[2 * B:]], 0)
    N = x.shape[0]
    id_num = N // 2 // num_pos
    is_neg = t[:, None] != t[None, :]
    is_neg_c2i = is_neg[::num_pos][:id_num]
    centers = np.stack([x[t == t[i * num_pos]].mean(0) for i in range(id_num)])
    e1 = (centers ** 2).sum(1, keepdims=True)
    e2 = (x ** 2).sum(1, keepdims=True).T
    d = e1 + e2 - 2.0 * centers @ x.T
    d = np.sqrt(np.clip(d, 1e-12, None))
    an = d * is_neg_c2i
    an = an[an > 1e-6].reshape(id_num, -1)
    d_neg = an.mean(1, keepdims=True)
    an = an * ((an - d_neg) < 0)
    list_an = [an[i][an[i] > 1e-6].mean() for i in range(id_num)]
    an_mean = sum(list_an) / len(list_an)
    ap = d * (~is_neg_c2i)
    ap_mean = ap[ap > 1e-6].mean()
    return ap_mean / an_mean


if __name__ == "__main__":
    num_pos = 4
    id_num = 4
    chunk = id_num * num_pos          # 16 samples per chunk
    total = 3 * chunk                 # forward expects 3 chunks along batch

    key = jax.random.PRNGKey(0)
    k1, k2 = jax.random.split(key)
    tgt_half = jnp.repeat(jnp.arange(id_num, dtype=jnp.int32), num_pos)
    targets = jnp.concatenate([tgt_half, tgt_half, tgt_half])

    # Small, sub-lane-width feature dim: exercises the unpadded single-shot path.
    D_small = 32
    x_small = jax.random.normal(k1, (total, D_small), dtype=jnp.float32)
    ref_small = dcl_reference(np.asarray(x_small), np.asarray(targets), num_pos=num_pos)

    loss_f32 = jax.block_until_ready(
        dcl_loss(x_small, targets, num_pos=num_pos, mxu_bf16=False))
    assert abs(float(loss_f32) - float(ref_small)) < 1e-2, (float(loss_f32), float(ref_small))

    loss_bf16 = jax.block_until_ready(
        dcl_loss(x_small, targets, num_pos=num_pos, mxu_bf16=True))
    assert abs(float(loss_bf16) - float(ref_small)) < 1e-1, (float(loss_bf16), float(ref_small))

    # Lane-aligned feature dim: exercises the pipelined Dp-tiled grid (tk=512, 2 steps).
    D_big = 1024
    x_big = jax.random.normal(k2, (total, D_big), dtype=jnp.float32)
    ref_big = dcl_reference(np.asarray(x_big), np.asarray(targets), num_pos=num_pos)
    loss_big = jax.block_until_ready(
        dcl_loss(x_big, targets, num_pos=num_pos, mxu_bf16=False))
    assert abs(float(loss_big) - float(ref_big)) < 1e-2, (float(loss_big), float(ref_big))

    print("KERNEL_OK")
</pallas_src>

<mosaic_0001>
module attributes {stable_mosaic.version = 11 : i64} {
  func.func @_dcl_kernel(%arg0: i32, %arg1: memref<4x1xi32, #tpu.memory_space<vmem>>, %arg2: memref<1x32xi32, #tpu.memory_space<vmem>>, %arg3: memref<16x32xf32, #tpu.memory_space<vmem>>, %arg4: memref<16x32xf32, #tpu.memory_space<vmem>>, %arg5: memref<1x1xf32, #tpu.memory_space<smem>>, %arg6: memref<4x32xf32, #tpu.memory_space<vmem>>, %arg7: memref<1x32xf32, #tpu.memory_space<vmem>>, %arg8: memref<4x1xf32, #tpu.memory_space<vmem>>) attributes {dimension_semantics = [#tpu.dimension_semantics<arbitrary>], iteration_bounds = array<i64: 1>, scalar_prefetch = 0 : i64, scratch_operands = 3 : i64, tpu.core_type = #tpu.core_type<tc>, window_params = [{pipeline_mode = #tpu.pipeline_mode<synchronous>, transform_indices = @transform_0, window_bounds = array<i64: 4, 1>}, {pipeline_mode = #tpu.pipeline_mode<synchronous>, transform_indices = @transform_1, window_bounds = array<i64: 1, 32>}, {transform_indices = @transform_2, window_bounds = array<i64: 16, 32>}, {transform_indices = @transform_3, window_bounds = array<i64: 16, 32>}, {transform_indices = @transform_4, window_bounds = array<i64: 1, 1>}]} {
    %c0_i32 = arith.constant 0 : i32
    %0 = arith.cmpi eq, %arg0, %c0_i32 : i32
    %1 = arith.extui %0 : i1 to i32
    %c0_i32_0 = arith.constant 0 : i32
    %2 = arith.cmpi ne, %1, %c0_i32_0 : i32
    scf.if %2 {
      %cst_29 = arith.constant 0.000000e+00 : f32
      %43 = vector.broadcast %cst_29 : f32 to vector<4x32xf32>
      %c0_30 = arith.constant 0 : index
      %c0_31 = arith.constant 0 : index
      %44 = vector.load %arg6[%c0_30, %c0_31] : memref<4x32xf32, #tpu.memory_space<vmem>>, vector<4x32xf32>
      tpu.vector_store %arg6[%c0_30, %c0_31], %43 {strides = array<i32>} : memref<4x32xf32, #tpu.memory_space<vmem>>, vector<4x32xf32>,
      %cst_32 = arith.constant 0.000000e+00 : f32
      %45 = vector.broadcast %cst_32 : f32 to vector<1x32xf32>
      %c0_33 = arith.constant 0 : index
      %c0_34 = arith.constant 0 : index
      %46 = vector.load %arg7[%c0_33, %c0_34] : memref<1x32xf32, #tpu.memory_space<vmem>>, vector<1x32xf32>
      tpu.vector_store %arg7[%c0_33, %c0_34], %45 {strides = array<i32>} : memref<1x32xf32, #tpu.memory_space<vmem>>, vector<1x32xf32>,
      %cst_35 = arith.constant 0.000000e+00 : f32
      %47 = vector.broadcast %cst_35 : f32 to vector<4x1xf32>
      %c0_36 = arith.constant 0 : index
      %c0_37 = arith.constant 0 : index
      %48 = vector.load %arg8[%c0_36, %c0_37] : memref<4x1xf32, #tpu.memory_space<vmem>>, vector<4x1xf32>
      tpu.vector_store %arg8[%c0_36, %c0_37], %47 {strides = array<i32>} : memref<4x1xf32, #tpu.memory_space<vmem>>, vector<4x1xf32>,
    } else {
    }
    %c0 = arith.constant 0 : index
    %c0_1 = arith.constant 0 : index
    %3 = vector.load %arg1[%c0, %c0_1] : memref<4x1xi32, #tpu.memory_space<vmem>>, vector<4x1xi32>
    %c0_2 = arith.constant 0 : index
    %c0_3 = arith.constant 0 : index
    %4 = vector.load %arg2[%c0_2, %c0_3] : memref<1x32xi32, #tpu.memory_space<vmem>>, vector<1x32xi32>
    %5 = vector.broadcast %3 : vector<4x1xi32> to vector<4x32xi32>
    %6 = vector.broadcast %4 : vector<1x32xi32> to vector<4x32xi32>
    %7 = arith.cmpi eq, %5, %6 : vector<4x32xi32>
    %c0_4 = arith.constant 0 : index
    %c0_5 = arith.constant 0 : index
    %8 = vector.load %arg3[%c0_4, %c0_5] : memref<16x32xf32, #tpu.memory_space<vmem>>, vector<16x32xf32>
    %c0_6 = arith.constant 0 : index
    %c0_7 = arith.constant 0 : index
    %9 = vector.load %arg4[%c0_6, %c0_7] : memref<16x32xf32, #tpu.memory_space<vmem>>, vector<16x32xf32>
    %10 = tpu.concatenate %8, %9 in 0 : vector<16x32xf32>, vector<16x32xf32> -> vector<32x32xf32>
    %cst = arith.constant 1.000000e+00 : f32
    %11 = vector.broadcast %cst : f32 to vector<1x32xf32>
    %c0_8 = arith.constant 0 : index
    %c0_9 = arith.constant 0 : index
    %12 = vector.load %arg7[%c0_8, %c0_9] : memref<1x32xf32, #tpu.memory_space<vmem>>, vector<1x32xf32>
    %13 = arith.mulf %10, %10 : vector<32x32xf32>
    %cst_10 = arith.constant dense<0.000000e+00> : vector<1x32xf32>
    %14 = tpu.matmul %11, %13, %cst_10 {dimension_numbers = #tpu.dot_dimension_numbers<[1], [1], [0], [0], [0, 0, 1, 0], [], []>} : vector<1x32xf32>, vector<32x32xf32>, vector<1x32xf32> -> vector<1x32xf32>
    %15 = arith.addf %12, %14 : vector<1x32xf32>
    %c0_11 = arith.constant 0 : index
    %c0_12 = arith.constant 0 : index
    %16 = vector.load %arg7[%c0_11, %c0_12] : memref<1x32xf32, #tpu.memory_space<vmem>>, vector<1x32xf32>
    tpu.vector_store %arg7[%c0_11, %c0_12], %15 {strides = array<i32>} : memref<1x32xf32, #tpu.memory_space<vmem>>, vector<1x32xf32>,
    %17 = arith.extui %7 : vector<4x32xi1> to vector<4x32xi32>
    %18 = arith.sitofp %17 : vector<4x32xi32> to vector<4x32xf32>
    %19 = arith.extui %7 : vector<4x32xi1> to vector<4x32xi32>
    %20 = arith.sitofp %19 : vector<4x32xi32> to vector<4x32xf32>
    %cst_13 = arith.constant dense<0.000000e+00> : vector<4xf32>
    %21 = vector.multi_reduction <add>, %20, %cst_13 [1] : vector<4x32xf32> to vector<4xf32>
    %22 = vector.shape_cast %21 : vector<4xf32> to vector<4x1xf32>
    %cst_14 = arith.constant 1.000000e+00 : f32
    %23 = vector.broadcast %cst_14 : f32 to vector<4x1xf32>
    %24 = arith.maximumf %22, %23 : vector<4x1xf32>
    %cst_15 = arith.constant 1.000000e+00 : f32
    %25 = vector.broadcast %cst_15 : f32 to vector<4x1xf32>
    %26 = arith.divf %25, %24 : vector<4x1xf32>
    %cst_16 = arith.constant dense<0.000000e+00> : vector<4x32xf32>
    %27 = tpu.matmul %18, %10, %cst_16 {dimension_numbers = #tpu.dot_dimension_numbers<[1], [0], [0], [1], [0, 0, 1, 1], [], []>} : vector<4x32xf32>, vector<32x32xf32>, vector<4x32xf32> -> vector<4x32xf32>
    %28 = vector.broadcast %26 : vector<4x1xf32> to vector<4x32xf32>
    %29 = arith.mulf %27, %28 : vector<4x32xf32>
    %c0_17 = arith.constant 0 : index
    %c0_18 = arith.constant 0 : index
    %30 = vector.load %arg8[%c0_17, %c0_18] : memref<4x1xf32, #tpu.memory_space<vmem>>, vector<4x1xf32>
    %31 = arith.mulf %29, %29 : vector<4x32xf32>
    %cst_19 = arith.constant dense<0.000000e+00> : vector<4xf32>
    %32 = vector.multi_reduction <add>, %31, %cst_19 [1] : vector<4x32xf32> to vector<4xf32>
    %33 = vector.shape_cast %32 : vector<4xf32> to vector<4x1xf32>
    %34 = arith.addf %30, %33 : vector<4x1xf32>
    %c0_20 = arith.constant 0 : index
    %c0_21 = arith.constant 0 : index
    %35 = vector.load %arg8[%c0_20, %c0_21] : memref<4x1xf32, #tpu.memory_space<vmem>>, vector<4x1xf32>
    tpu.vector_store %arg8[%c0_20, %c0_21], %34 {strides = array<i32>} : memref<4x1xf32, #tpu.memory_space<vmem>>, vector<4x1xf32>,
    %c0_22 = arith.constant 0 : index
    %c0_23 = arith.constant 0 : index
    %36 = vector.load %arg6[%c0_22, %c0_23] : memref<4x32xf32, #tpu.memory_space<vmem>>, vector<4x32xf32>
    %cst_24 = arith.constant dense<0.000000e+00> : vector<4x32xf32>
    %37 = tpu.matmul %29, %10, %cst_24 {dimension_numbers = #tpu.dot_dimension_numbers<[1], [1], [0], [0], [0, 0, 1, 0], [], []>} : vector<4x32xf32>, vector<32x32xf32>, vector<4x32xf32> -> vector<4x32xf32>
    %38 = arith.addf %36, %37 : vector<4x32xf32>
    %c0_25 = arith.constant 0 : index
    %c0_26 = arith.constant 0 : index
    %39 = vector.load %arg6[%c0_25, %c0_26] : memref<4x32xf32, #tpu.memory_space<vmem>>, vector<4x32xf32>
    tpu.vector_store %arg6[%c0_25, %c0_26], %38 {strides = array<i32>} : memref<4x32xf32, #tpu.memory_space<vmem>>, vector<4x32xf32>,
    %c0_i32_27 = arith.constant 0 : i32
    %40 = arith.cmpi eq, %arg0, %c0_i32_27 : i32
    %41 = arith.extui %40 : i1 to i32
    %c0_i32_28 = arith.constant 0 : i32
    %42 = arith.cmpi ne, %41, %c0_i32_28 : i32
    scf.if %42 {
      %c0_29 = arith.constant 0 : index
      %c0_30 = arith.constant 0 : index
      %43 = vector.load %arg8[%c0_29, %c0_30] : memref<4x1xf32, #tpu.memory_space<vmem>>, vector<4x1xf32>
      %c0_31 = arith.constant 0 : index
      %c0_32 = arith.constant 0 : index
      %44 = vector.load %arg7[%c0_31, %c0_32] : memref<1x32xf32, #tpu.memory_space<vmem>>, vector<1x32xf32>
      %45 = vector.broadcast %43 : vector<4x1xf32> to vector<4x32xf32>
      %46 = vector.broadcast %44 : vector<1x32xf32> to vector<4x32xf32>
      %47 = arith.addf %45, %46 : vector<4x32xf32>
      %c0_33 = arith.constant 0 : index
      %c0_34 = arith.constant 0 : index
      %48 = vector.load %arg6[%c0_33, %c0_34] : memref<4x32xf32, #tpu.memory_space<vmem>>, vector<4x32xf32>
      %cst_35 = arith.constant 2.000000e+00 : f32
      %49 = vector.broadcast %cst_35 : f32 to vector<4x32xf32>
      %50 = arith.mulf %49, %48 : vector<4x32xf32>
      %51 = arith.subf %47, %50 : vector<4x32xf32>
      %cst_36 = arith.constant 9.99999996E-13 : f32
      %52 = vector.broadcast %cst_36 : f32 to vector<4x32xf32>
      %53 = arith.maximumf %51, %52 : vector<4x32xf32>
      %54 = math.sqrt %53 : vector<4x32xf32>
      %cst_37 = arith.constant 9.99999997E-7 : f32
      %55 = vector.broadcast %cst_37 : f32 to vector<4x32xf32>
      %56 = arith.cmpf ogt, %54, %55 : vector<4x32xf32>
      %cst_38 = arith.constant dense<true> : vector<4x32xi1>
      %57 = arith.xori %7, %cst_38 : vector<4x32xi1>
      %58 = arith.andi %57, %56 : vector<4x32xi1>
      %59 = arith.extui %58 : vector<4x32xi1> to vector<4x32xi32>
      %60 = arith.sitofp %59 : vector<4x32xi32> to vector<4x32xf32>
      %61 = arith.andi %7, %56 : vector<4x32xi1>
      %62 = arith.extui %61 : vector<4x32xi1> to vector<4x32xi32>
      %63 = arith.sitofp %62 : vector<4x32xi32> to vector<4x32xf32>
      %64 = arith.mulf %54, %60 : vector<4x32xf32>
      %cst_39 = arith.constant dense<0.000000e+00> : vector<4xf32>
      %65 = vector.multi_reduction <add>, %64, %cst_39 [1] : vector<4x32xf32> to vector<4xf32>
      %66 = vector.shape_cast %65 : vector<4xf32> to vector<4x1xf32>
      %cst_40 = arith.constant dense<0.000000e+00> : vector<4xf32>
      %67 = vector.multi_reduction <add>, %60, %cst_40 [1] : vector<4x32xf32> to vector<4xf32>
      %68 = vector.shape_cast %67 : vector<4xf32> to vector<4x1xf32>
      %cst_41 = arith.constant 1.000000e+00 : f32
      %69 = vector.broadcast %cst_41 : f32 to vector<4x1xf32>
      %70 = arith.maximumf %68, %69 : vector<4x1xf32>
      %71 = arith.divf %66, %70 : vector<4x1xf32>
      %72 = vector.broadcast %71 : vector<4x1xf32> to vector<4x32xf32>
      %73 = arith.cmpf olt, %54, %72 : vector<4x32xf32>
      %74 = arith.extui %73 : vector<4x32xi1> to vector<4x32xi32>
      %75 = arith.sitofp %74 : vector<4x32xi32> to vector<4x32xf32>
      %76 = arith.mulf %60, %75 : vector<4x32xf32>
      %77 = arith.mulf %54, %76 : vector<4x32xf32>
      %cst_42 = arith.constant dense<0.000000e+00> : vector<4xf32>
      %78 = vector.multi_reduction <add>, %77, %cst_42 [1] : vector<4x32xf32> to vector<4xf32>
      %79 = vector.shape_cast %78 : vector<4xf32> to vector<4x1xf32>
      %cst_43 = arith.constant dense<0.000000e+00> : vector<4xf32>
      %80 = vector.multi_reduction <add>, %76, %cst_43 [1] : vector<4x32xf32> to vector<4xf32>
      %81 = vector.shape_cast %80 : vector<4xf32> to vector<4x1xf32>
      %cst_44 = arith.constant 1.000000e+00 : f32
      %82 = vector.broadcast %cst_44 : f32 to vector<4x1xf32>
      %83 = arith.maximumf %81, %82 : vector<4x1xf32>
      %84 = tpu.reciprocal %83 {approx = true} : vector<4x1xf32> -> vector<4x1xf32>
      %85 = arith.mulf %79, %84 : vector<4x1xf32>
      %86 = vector.shape_cast %85 : vector<4x1xf32> to vector<1x4x1xf32>
      %cst_45 = arith.constant dense<0.000000e+00> : vector<1xf32>
      %87 = vector.multi_reduction <add>, %86, %cst_45 [1, 2] : vector<1x4x1xf32> to vector<1xf32>
      %88 = vector.shape_cast %87 : vector<1xf32> to vector<1x1x1xf32>
      %89 = vector.extract %88[0, 0, 0] : f32 from vector<1x1x1xf32>
      %cst_46 = arith.constant 2.500000e-01 : f32
      %90 = arith.mulf %89, %cst_46 : f32
      %91 = arith.mulf %54, %63 : vector<4x32xf32>
      %92 = vector.shape_cast %91 : vector<4x32xf32> to vector<1x4x32xf32>
      %cst_47 = arith.constant dense<0.000000e+00> : vector<1xf32>
      %93 = vector.multi_reduction <add>, %92, %cst_47 [1, 2] : vector<1x4x32xf32> to vector<1xf32>
      %94 = vector.shape_cast %93 : vector<1xf32> to vector<1x1x1xf32>
      %95 = vector.extract %94[0, 0, 0] : f32 from vector<1x1x1xf32>
      %96 = vector.shape_cast %63 : vector<4x32xf32> to vector<1x4x32xf32>
      %cst_48 = arith.constant dense<0.000000e+00> : vector<1xf32>
      %97 = vector.multi_reduction <add>, %96, %cst_48 [1, 2] : vector<1x4x32xf32> to vector<1xf32>
      %98 = vector.shape_cast %97 : vector<1xf32> to vector<1x1x1xf32>
      %99 = vector.extract %98[0, 0, 0] : f32 from vector<1x1x1xf32>
      %cst_49 = arith.constant 1.000000e+00 : f32
      %100 = arith.maximumf %99, %cst_49 : f32
      %101 = arith.divf %95, %100 : f32
      %102 = arith.divf %101, %90 : f32
      %c0_50 = arith.constant 0 : index
      %c0_51 = arith.constant 0 : index
      %103 = memref.load %arg5[%c0_50, %c0_51] : memref<1x1xf32, #tpu.memory_space<smem>>
      memref.store %102, %arg5[%c0_50, %c0_51] : memref<1x1xf32, #tpu.memory_space<smem>>
    } else {
    }
    return
  }
  func.func @transform_0(%arg0: i32) -> (i32, i32) {
    %c0_i32 = arith.constant 0 : i32
    %c0_i32_0 = arith.constant 0 : i32
    %c0_i32_1 = arith.constant 0 : i32
    return %c0_i32, %c0_i32_0 : i32, i32
  }
  func.func @transform_1(%arg0: i32) -> (i32, i32) {
    %c0_i32 = arith.constant 0 : i32
    %c0_i32_0 = arith.constant 0 : i32
    %c0_i32_1 = arith.constant 0 : i32
    return %c0_i32, %c0_i32_0 : i32, i32
  }
  func.func @transform_2(%arg0: i32) -> (i32, i32) {
    %c0_i32 = arith.constant 0 : i32
    %c0_i32_0 = arith.constant 0 : i32
    return %c0_i32, %arg0 : i32, i32
  }
  func.func @transform_3(%arg0: i32) -> (i32, i32) {
    %c2_i32 = arith.constant 2 : i32
    %c0_i32 = arith.constant 0 : i32
    return %c2_i32, %arg0 : i32, i32
  }
  func.func @transform_4(%arg0: i32) -> (i32, i32) {
    %c0_i32 = arith.constant 0 : i32
    %c0_i32_0 = arith.constant 0 : i32
    %c0_i32_1 = arith.constant 0 : i32
    return %c0_i32, %c0_i32_0 : i32, i32
  }
}

</mosaic_0001>

<bundles_post_ra>
// kernel: tpu_custom_call.1
= control target key start
LH: loop header
LB: loop body
LE: loop exit
PB: predicated region body
PF: predicated region fallthrough
CT: control target
= control target key end

     0   :  { %v567_v3 = vmov 0   ;;  %v568_v4 = vmov 0.0|0.0   ;;  %s675_s0 = inlined_call_operand.vmem [shape: s32[4,1], index: 0, kind: input, shape index: {}]   ;;  %s676_s1 = inlined_call_operand.vmem [shape: s32[1,32], index: 1, kind: input, shape index: {}]   ;;  %s677_s2 = inlined_call_operand.vmem [shape: f32[48,32], index: 2, kind: input, shape index: {}]   ;;  %s678_s3 = inlined_call_operand.vmem [shape: f32[48,32], index: 3, kind: input, shape index: {}]   ;;  %s679_s4 = inlined_call_operand.hbm [shape: f32[1,1], index: 4, kind: output, shape index: {}]  }
   0x1   :  { %v31_v0 = vld [vmem:[%s675_s0] sm:$0xf]  ;;  %v42_v2 = vld [vmem:[%s677_s2 + $0x8] sm:$0xff]  ;;  %541 = vset.pattern.permute.xlu0 %v567_v3  ;;  %509 = vmatprep.subr.bf16.mxu1 %v568_v4 }
   0x2   :  { %v41_v1 = vld [vmem:[%s677_s2] sm:$0xff]  ;;  %v436_v7 = vld [vmem:[%s678_s3 + $0x28] sm:$0xff]  ;;  %34 = vperm.xlu0 %541, %v31_v0   ;;  %501 = vmatprep.subr.bf16.mxu0 %v568_v4 }
   0x3   :  { %v510_v5 = vpack.c.bf16 %v42_v2, %v41_v1  ;;  %v435_v6 = vld [vmem:[%s678_s3 + $0x20] sm:$0xff] }
   0x4   :  { %9 = vsyncpa [#allocation6], 0  ;;  %v513_v8 = vpack.c.bf16 %v436_v7, %v435_v6  ;;  %vm25_vm0 = vcmask 257024   ;;  %542 = vset.pattern.permute.xlu1 %v567_v3  ;;  %vm569_vm1 = vmmov 0   ;;  %v570_v9 = vmov 0.0   ;;  %s573_s27 = smov 1.0  }
   0x5   :  { %511 = vmatpush3.bf16.msra.mxu1 %v510_v5  ;;  %487 = vmatprep.mubr.msk.f32.mxu1 %vm569_vm1, %v570_v9  ;;  %26 = vst.msk [vmem:[#allocation2] sm:$0xf] %vm25_vm0, %v570_v9  ;;  %v622_v10 = vld [vmem:[%s676_s1] ss:$0 sm:$0xff]  ;;  %vm50_vm2 = vcmask 261120   ;;  %v46_v14 = vmul.f32 %v41_v1, %v41_v1  ;;  %v47_v15 = vmul.f32 %v42_v2, %v42_v2  ;;  %vm29_vm5 = vcmask 3072  }
   0x6   :  { %512 = vmatprep.subr.bf16.mxu1 %v568_v4  ;;  %476 = vmatprep.mubr.msk.f32.mxu0 %vm569_vm1, %v570_v9  ;;  %vm503_vm4 = vmpackc.low %vm50_vm2, %vm50_vm2  ;;  %v48_v16 = vmul.f32 %v435_v6, %v435_v6  ;;  %v49_v17 = vmul.f32 %v436_v7, %v436_v7  ;;  %30 = vst.msk [vmem:[#allocation4] sm:$0xf] %vm29_vm5, %v570_v9  ;;  %v571_v20 = vmov 1.0   ;;  %vm27_vm6 = vcmask 253952   ;;  %s555_s9 = scalar_lea.hbm %s679_s4, 16 }
   0x7   :  { %v502_v18 = vpack.c.bf16 %v47_v15, %v46_v14  ;;  %28 = vst.msk [vmem:[#allocation3] sm:$0x1] %vm27_vm6, %v570_v9  ;;  %vm572_vm9 = vmmov 1   ;;  %p556_p0 = scmp.ne.s32.totalorder %s679_s4, %s555_s9  ;;  %p559_p1 = scmp.lt.u32.totalorder %s555_s9, %s679_s4 }
   0x8   :  { %v506_v19 = vpack.c.bf16 %v49_v17, %v48_v16 }
   0x9   :  { %514 = vmatpush3.bf16.msra.mxu1 %v513_v8  ;;  %504 = vmatpush3.bf16.xpose.msk.msra.mxu0 %vm503_vm4, %v502_v18  ;;  %p561_p2 = pnand %p559_p1, %p556_p0 }
   0xa   :  { %515 = vmatprep.subr.bf16.mxu1 %v568_v4  ;;  %505 = vmatprep.subr.bf16.mxu0 %v568_v4 }
   0xc   :  { %v230_v37 = vld [vmem:[#allocation2] sm:$0xf] }
   0xd   :  { %v222_v33 = vld [vmem:[#allocation4] sm:$0xf] }
   0xe   :  { %v45_v29 = vld [vmem:[#allocation3] sm:$0x1] }
  0x11   :  { %508 = vmatpush3.bf16.xpose.msk.msra.mxu0 %vm503_vm4, %v506_v19 }
  0x18   :  { %477 = vmatmul.mubr.msk.f32.vlgmr.msra.gmra.mrb[0].mxu0 %vm50_vm2, %v571_v20 }
  0x81   :  { %v624_v11 = vpop.permute.xlu0 %34 }
  0x82   :  { %vm40_vm3 = vcmp.eq.s32.totalorder %v624_v11, %v622_v10 }
  0x83   :  { %v442_v12 = vsel %vm40_vm3, 1.0, %v570_v9  ;;  %vm347_vm10 = vmxor %vm40_vm3, %vm572_vm9 }
  0x84   :  { %488 = vmatmul.mubr.msk.f32.vlgmr.msra.gmra.mrb[0].mxu1 %vm50_vm2, %v442_v12  ;;  %v142_v13 = vsel %vm25_vm0, %v442_v12, 0.0 }
  0x85   :  { %143 = vadd.xlane.f32.xlu0 %v142_v13  ;;  %498 = vmatprep.mubr.msk.f32.mxu1 %vm569_vm1, %v570_v9 }
  0x86   :  { %518 = vmatpush3.bf16.xpose.msk.msra.mxu1 %vm503_vm4, %v510_v5 }
  0x87   :  { %519 = vmatprep.subr.bf16.mxu1 %v568_v4 }
  0x8e   :  { %522 = vmatpush3.bf16.xpose.msk.msra.mxu1 %vm503_vm4, %v513_v8 }
  0xeb   :  { %v132_v30 = vpop.f32.mrb[0].mxu0 }
  0xec   :  { %v136_v31 = vadd.f32 %v132_v30, %v45_v29  ;;  %v478_v32 = vpop.f32.mrb[1].mxu0 }
  0xee   :  { %138 = vst.msk [vmem:[#allocation3] sm:$0x1] %vm27_vm6, %v136_v31 }
  0xf5   :  { %v449_v41 = vld [vmem:[#allocation3] ss:$0 sm:$0xff] }
 0x112   :  { %v144_v21 = vpop.xlane.xlu0 %143 }
 0x113   :  { %v145_v22 = vmax.f32 %v144_v21, 1.0 }
 0x115   :  { %543 = vrcp.f32 %v145_v22 }
 0x11f   :  { %v544_v23 = vpop.eup %543 }
 0x157   :  { %v217_v24 = vpop.f32.mrb[0].mxu1 }
 0x158   :  { %v221_v25 = vmul.f32 %v544_v23, %v217_v24  ;;  %v489_v26 = vpop.f32.mrb[1].mxu1 }
 0x15a   :  { %499 = vmatmul.mubr.msk.f32.vlgmr.msra.gmra.mrb[2].mxu1 %vm50_vm2, %v221_v25  ;;  %v223_v27 = vmul.f32 %v221_v25, %v221_v25 }
 0x15c   :  { %v224_v28 = vsel %vm25_vm0, %v223_v27, 0.0 }
 0x15d   :  { %225 = vadd.xlane.f32.xlu1 %v224_v28 }
 0x1ea   :  { %v226_v34 = vpop.xlane.xlu1 %225 }
 0x1eb   :  { %v227_v35 = vadd.f32 %v226_v34, %v222_v33 }
 0x1ed   :  { %229 = vst.msk [vmem:[#allocation4] sm:$0xf] %vm29_vm5, %v227_v35 }
 0x1f4   :  { %v321_v36 = vld [vmem:[#allocation4] sm:$0xf] }
 0x1f5   :  { %325 = vperm.xlu1 %542, %v321_v36  }
 0x22d   :  { %v312_v38 = vpop.f32.mrb[2].mxu1 }
 0x22e   :  { %v316_v39 = vadd.f32 %v312_v38, %v230_v37  ;;  %v500_v40 = vpop.f32.mrb[3].mxu1 }
 0x230   :  { %317 = vst.msk [vmem:[#allocation2] sm:$0xf] %vm25_vm0, %v316_v39 }
 0x237   :  { %v335_v42 = vld [vmem:[#allocation2] sm:$0xf] }
 0x238   :  { %v336_v45 = vmul.f32 2.0, %v335_v42 }
 0x274   :  { %v326_v43 = vpop.permute.xlu1 %325 }
 0x275   :  { %v334_v44 = vadd.f32 %v449_v41, %v326_v43 }
 0x277   :  { %v337_v46 = vsub.f32 %v334_v44, %v336_v45 }
 0x279   :  { %v338_v47 = vmax.f32 %v337_v46, 1e-12 }
 0x27b   :  { %545 = vrsqrt.f32 %v338_v47  ;;  %vm341_vm7 = vcmp.eq.f32.partialorder %v338_v47, inf  ;;  %v344_v50 = vand.u32 2147483648, %v338_v47  ;;  %vm343_vm8 = vcmp.eq.f32.partialorder %v338_v47, 0.0 }
 0x285   :  { %v546_v48 = vpop.eup %545 }
 0x286   :  { %v340_v49 = vmul.f32 %v546_v48, %v338_v47 }
 0x288   :  { %v342_v51 = vsel %vm341_vm7, %v338_v47, %v340_v49 }
 0x289   :  { %v345_v52 = vsel %vm343_vm8, %v344_v50, %v342_v51 }
 0x28a   :  { %vm346_vm11 = vcmp.gt.f32.partialorder %v345_v52, 1e-06 }
 0x28b   :  { %vm348_vm12 = vmand %vm347_vm10, %vm346_vm11 }
 0x28c   :  { %v450_v53 = vsel %vm348_vm12, 1.0, %v570_v9  ;;  %vm351_vm14 = vmand %vm40_vm3, %vm346_vm11 }
 0x28d   :  { %v358_v54 = vsel %vm25_vm0, %v450_v53, 0.0  ;;  %v354_v55 = vmul.f32 %v450_v53, %v345_v52  ;;  %v451_v2 = vsel %vm351_vm14, 1.0, %v570_v9 }
 0x28e   :  { %359 = vadd.xlane.f32.xlu1 %v358_v54  ;;  %v389_v4 = vmul.f32 %v451_v2, %v345_v52  ;;  %v400_v13 = vsel %vm25_vm0, %v451_v2, 0.0 }
 0x28f   :  { %v355_v56 = vsel %vm25_vm0, %v354_v55, 0.0 }
 0x290   :  { %356 = vadd.xlane.f32.xlu0 %v355_v56  ;;  %v390_v5 = vsel %vm25_vm0, %v389_v4, 0.0 }
 0x31b   :  { %v360_v57 = vpop.xlane.xlu1 %359 }
 0x31c   :  { %v361_v58 = vmax.f32 %v360_v57, 1.0 }
 0x31d   :  { %v357_v60 = vpop.xlane.xlu0 %356 }
 0x31e   :  { %547 = vrcp.f32 %v361_v58 }
 0x328   :  { %v548_v59 = vpop.eup %547 }
 0x329   :  { %v363_v61 = vmul.f32 %v548_v59, %v357_v60 }
 0x32b   :  { %vm364_vm13 = vcmp.lt.f32.partialorder %v345_v52, %v363_v61 }
 0x32c   :  { %v452_v62 = vsel %vm364_vm13, 1.0, %v570_v9 }
 0x32d   :  { %v367_v63 = vmul.f32 %v452_v62, %v450_v53 }
 0x32f   :  { %v372_v0 = vsel %vm25_vm0, %v367_v63, 0.0  ;;  %v368_v1 = vmul.f32 %v367_v63, %v345_v52 }
 0x330   :  { %373 = vadd.xlane.f32.xlu0 %v372_v0 }
 0x331   :  { %v369_v3 = vsel %vm25_vm0, %v368_v1, 0.0 }
 0x334   :  { %370 = vadd.xlane.f32.xlu0 %v369_v3 }
 0x338   :  { %391 = vadd.xlane.f32.xlu0 %v390_v5 }
 0x3bd   :  { %v374_v6 = vpop.xlane.xlu0 %373 }
 0x3be   :  { %v375_v7 = vmax.f32 %v374_v6, 1.0 }
 0x3c0   :  { %549 = vrcp.f32 %v375_v7 }
 0x3c1   :  { %v371_v12 = vpop.xlane.xlu0 %370 }
 0x3c5   :  { %v392_v9 = vpop.xlane.xlu0 %391 }
 0x3c6   :  { %v393_v14 = vrot.slane %v392_v9, 4 }
 0x3c8   :  { %v394_v15 = vadd.f32 %v393_v14, %v392_v9 }
 0x3ca   :  { %v550_v8 = vpop.eup %549  ;;  %v395_v16 = vrot.slane %v394_v15, 2 }
 0x3cb   :  { %v377_v10 = vmul.f32 %v550_v8, %v371_v12 }
 0x3cc   :  { %v396_v21 = vadd.f32 %v395_v16, %v394_v15 }
 0x3cd   :  { %v378_v11 = vsel %vm29_vm5, %v377_v10, 0.0 }
 0x3ce   :  { %379 = vadd.xlane.f32.xlu0 %v378_v11  ;;  %v397_v26 = vrot.slane %v396_v21, 1 }
 0x3d0   :  { %v398_v31 = vadd.f32 %v397_v26, %v396_v21 }
 0x3d2   :  { %401 = vadd.xlane.f32.xlu0 %v400_v13 }
 0x45b   :  { %v380_v17 = vpop.xlane.xlu0 %379 }
 0x45c   :  { %v381_v18 = vrot.slane %v380_v17, 4 }
 0x45e   :  { %v382_v19 = vadd.f32 %v381_v18, %v380_v17 }
 0x45f   :  { %v402_v20 = vpop.xlane.xlu0 %401 }
 0x460   :  { %v383_v22 = vrot.slane %v382_v19, 2  ;;  %v403_v23 = vrot.slane %v402_v20, 4 }
 0x462   :  { %v404_v24 = vadd.f32 %v403_v23, %v402_v20  ;;  %v384_v25 = vadd.f32 %v383_v22, %v382_v19 }
 0x464   :  { %v405_v27 = vrot.slane %v404_v24, 2  ;;  %v385_v28 = vrot.slane %v384_v25, 1 }
 0x466   :  { %v406_v29 = vadd.f32 %v405_v27, %v404_v24  ;;  %v386_v30 = vadd.f32 %v385_v28, %v384_v25 }
 0x468   :  { %523 = vpush %v386_v30  ;;  %v407_v32 = vrot.slane %v406_v29, 1 }
 0x469   :  { %525 = vpush %v398_v31 }
 0x46a   :  { %v408_v33 = vadd.f32 %v407_v32, %v406_v29 }
 0x46c   :  { %527 = vpush %v408_v33 }
 0x499   :  { %s524_s1 = spop %523 }
 0x49a   :  { %s388_s3 = smul.f32 0.25, %s524_s1  ;;  %s526_s25 = spop %525 }
 0x49c   :  { %v415_v34 = vstv %s388_s3 }
 0x49d   :  { %s528_s26 = spop %527 }
 0x49e   :  { %s410_s28 = smax.f32 %s573_s27, %s528_s26 }
 0x49f   :  { %v411_v35 = vstv %s410_s28 }
 0x4a0   :  { %551 = vrcp.f32 %v411_v35 }
 0x4a1   :  { %553 = vrcp.f32 %v415_v34 }
 0x4aa   :  { %v552_v36 = vpop.eup %551 }
 0x4ab   :  { %v554_v37 = vpop.eup %553  ;;  %529 = vpush %v552_v36 }
 0x4ac   :  { %531 = vpush %v554_v37 }
 0x4dc   :  { %s530_s29 = spop %529 }
 0x4dd   :  { %s414_s30 = smul.f32 %s530_s29, %s526_s25  ;;  %s532_s5 = spop %531 }
 0x4df   :  { %s418_s6 = smul.f32 %s532_s5, %s414_s30 }
 0x4e1   :  { %420 = sst [smem:[#allocation5]] %s418_s6 }
 0x4e2   :  { %564 = shalt.err (!%p561_p2)
}
 0x4e3   :  { %s574_s14 = smov [#allocation5]  }
 0x4e4   :  { %428 = dma.smem_to_hbm %s574_s14, 16, %s679_s4, [#allocation6]  }
 0x4e5   :  { %565 = dma.done.wait [#allocation6], 16  }
 0x4e6   :  { %566 = vsyncadd [#allocation6], 4294967280 }
 0x4e7   :  { %432 = sfence }
 0x4e8   :  { %433 = vsyncpa [#allocation6], 1 }

</bundles_post_ra>
